<compile_context>
chip_gen: v6e
topology: v6e:2x2x1
jax: 0.10.0
libtpu: 0.0.40
codegen_flags: <defaults>
</compile_context>

<pallas_src>
import functools

import jax
import jax.numpy as jnp
from jax.experimental import pallas as pl
from jax.experimental.pallas import tpu as pltpu

HIDDEN_DIM = 64
INPUT_DIM = 1
OUTPUT_DIM = 1
NUM_HIDDEN_LAYERS = 4
NUM_HEADS = NUM_HIDDEN_LAYERS + 1           # 5 output heads
NUM_MATMULS = NUM_HIDDEN_LAYERS - 1         # 3 hidden 64x64 layers
AUG_DIM = 72                                # 64 hidden rows + 1 head row, padded to sublane mult.
LAST_DIM = 8                                # heads 3,4 in rows 0,1; padded to 8 sublanes
LANE = 128


def mlp_kernel(x_ref, w_in_ref, b_in_ref, w_aug_ref, b_h_ref,
               w_last_ref, b_out_ref, out_ref, *, mxu_bf16=False):
    """Lane-major forward (batch on the lane axis).

    x_ref     : [1, TB]        inputs, batch on lanes
    w_in_ref  : [64, 1]        input-layer weight column
    b_in_ref  : [64, 1]        input-layer bias column
    w_aug_ref : [3, 72, 64]    rows 0:64 = hidden W_i, row 64 = head_i weights, rest 0
    b_h_ref   : [3, 64, 1]     hidden biases (columns)
    w_last_ref: [8, 64]        rows 0,1 = head 3 / head 4 weights, rest 0
    b_out_ref : [5, 1]         head biases
    out_ref   : [5, TB]        head outputs, batch on lanes
    """
    def mxu_dot(w, h):
        if mxu_bf16:
            w = w.astype(jnp.bfloat16)
            h = h.astype(jnp.bfloat16)
        return jnp.dot(w, h, preferred_element_type=jnp.float32)

    # Input layer (K=1): VPU broadcast multiply, no MXU.  [64,1]*[1,TB] -> [64,TB]
    h = jnp.tanh(w_in_ref[...] * x_ref[...] + b_in_ref[...])

    # Hidden layers on the MXU; head i rides as row 64 of matmul i
    # (its LHS input activation is exactly the activation head i projects).
    for i in range(NUM_MATMULS):
        z = mxu_dot(w_aug_ref[i], h)                                  # [72, TB]
        out_ref[i:i + 1, :] = (z[HIDDEN_DIM:HIDDEN_DIM + 1, :]
                               + b_out_ref[i:i + 1, :])
        h = jnp.tanh(z[:HIDDEN_DIM, :] + b_h_ref[i])                  # [64, TB]

    # Heads 3 and 4 share the final activation: one small [8,64]@[64,TB] dot.
    z_last = mxu_dot(w_last_ref[...], h)                              # [8, TB]
    out_ref[NUM_MATMULS:NUM_HEADS, :] = (
        z_last[0:2, :] + b_out_ref[NUM_MATMULS:NUM_HEADS, :])


def _round_up(v, m):
    return ((v + m - 1) // m) * m


def _choose_tile(batch, tile_b):
    """Lane-aligned batch tile.  Keeps >= 2 grid steps whenever the batch has
    at least 2 lane-groups so v7x's two TensorCores both get work."""
    b_lanes = _round_up(max(batch, 1), LANE)
    tile_b = max(LANE, (tile_b // LANE) * LANE)
    if b_lanes <= tile_b:
        if b_lanes >= 2 * LANE:
            tb = _round_up(b_lanes // 2, LANE)     # split into ~2 tiles
        else:
            tb = b_lanes                           # tiny batch: single 128-lane tile
    else:
        tb = tile_b                                # large batch: n_tiles >= 2 automatically
    n_tiles = pl.cdiv(b_lanes, tb)
    return tb, n_tiles


@functools.partial(jax.jit, static_argnames=("tile_b", "mxu_bf16"))
def _mlp_forward_packed(x, packed, tile_b=2048, mxu_bf16=False):
    B = x.shape[0]
    TB, n_tiles = _choose_tile(B, tile_b)
    B_pad = n_tiles * TB

    # Put the batch on the lane (last) axis: [B, 1] -> [1, B_pad].
    x_t = x.reshape(1, B)
    if B_pad != B:
        x_t = jnp.pad(x_t, ((0, 0), (0, B_pad - B)))

    kernel = functools.partial(mlp_kernel, mxu_bf16=mxu_bf16)
    out = pl.pallas_call(
        kernel,
        out_shape=jax.ShapeDtypeStruct((NUM_HEADS, B_pad), jnp.float32),
        grid=(n_tiles,),
        in_specs=[
            pl.BlockSpec((1, TB), lambda b: (0, b)),                    # x (lane-major)
            pl.BlockSpec((HIDDEN_DIM, 1), lambda b: (0, 0)),            # w_in
            pl.BlockSpec((HIDDEN_DIM, 1), lambda b: (0, 0)),            # b_in
            pl.BlockSpec((NUM_MATMULS, AUG_DIM, HIDDEN_DIM),
                         lambda b: (0, 0, 0)),                          # w_aug (head-fused)
            pl.BlockSpec((NUM_MATMULS, HIDDEN_DIM, 1),
                         lambda b: (0, 0, 0)),                          # b_h
            pl.BlockSpec((LAST_DIM, HIDDEN_DIM), lambda b: (0, 0)),     # w_last (heads 3,4)
            pl.BlockSpec((NUM_HEADS, 1), lambda b: (0, 0)),             # b_out
        ],
        out_specs=pl.BlockSpec((NUM_HEADS, TB), lambda b: (0, b)),
        compiler_params=pltpu.CompilerParams(
            dimension_semantics=("parallel",)),
    )(x_t, packed["w_in"], packed["b_in"], packed["w_aug"], packed["b_h"],
      packed["w_last"], packed["b_out"])
    return out[:, :B]


def mlp_forward(x, packed, tile_b=2048, mxu_bf16=False):
    out = _mlp_forward_packed(x, packed, tile_b=tile_b, mxu_bf16=mxu_bf16)
    B = x.shape[0]
    # Match PyTorch: list of (num_hidden_layers + 1) tensors of shape [B, 1].
    return [out[i, :].reshape(B, OUTPUT_DIM) for i in range(NUM_HEADS)]


def init_params(key):
    """nn.Linear-style init U(-1/sqrt(fan_in), 1/sqrt(fan_in)), PyTorch layouts."""
    ks = jax.random.split(key, 2 * (1 + NUM_MATMULS + NUM_HEADS))
    it = iter(ks)

    def lin(fan_in, fan_out):
        bound = 1.0 / float(fan_in) ** 0.5
        w = jax.random.uniform(next(it), (fan_out, fan_in), jnp.float32, -bound, bound)
        b = jax.random.uniform(next(it), (fan_out,), jnp.float32, -bound, bound)
        return w, b

    w_in, b_in = lin(INPUT_DIM, HIDDEN_DIM)               # [64,1], [64]
    w_h, b_h = [], []
    for _ in range(NUM_MATMULS):
        w, b = lin(HIDDEN_DIM, HIDDEN_DIM)                # [64,64], [64]
        w_h.append(w)
        b_h.append(b)
    w_out, b_out = [], []
    for _ in range(NUM_HEADS):
        w, b = lin(HIDDEN_DIM, OUTPUT_DIM)                # [1,64], [1]
        w_out.append(w)
        b_out.append(b)
    return {"w_in": w_in, "b_in": b_in, "w_h": w_h, "b_h": b_h,
            "w_out": w_out, "b_out": b_out}


def pack_params(raw):
    """Pack PyTorch-layout params into the kernel's lane-major, head-fused layout."""
    w_aug = []
    for i in range(NUM_MATMULS):
        wa = jnp.zeros((AUG_DIM, HIDDEN_DIM), jnp.float32)
        wa = wa.at[:HIDDEN_DIM, :].set(raw["w_h"][i])          # hidden layer i (out,in)
        wa = wa.at[HIDDEN_DIM, :].set(raw["w_out"][i][0])      # head i fused as row 64
        w_aug.append(wa)
    w_last = jnp.zeros((LAST_DIM, HIDDEN_DIM), jnp.float32)
    w_last = w_last.at[0, :].set(raw["w_out"][NUM_MATMULS][0])      # head 3
    w_last = w_last.at[1, :].set(raw["w_out"][NUM_MATMULS + 1][0])  # head 4
    return {
        "w_in": raw["w_in"].reshape(HIDDEN_DIM, 1),
        "b_in": raw["b_in"].reshape(HIDDEN_DIM, 1),
        "w_aug": jnp.stack(w_aug),                                        # [3,72,64]
        "b_h": jnp.stack([b.reshape(HIDDEN_DIM, 1) for b in raw["b_h"]]),  # [3,64,1]
        "w_last": w_last,                                                 # [8,64]
        "b_out": jnp.stack(raw["b_out"]).reshape(NUM_HEADS, 1),           # [5,1]
    }


def mlp_forward_ref(x, raw):
    """Pure-JAX reference of the PyTorch forward for validation."""
    hi = jax.lax.Precision.HIGHEST
    outs = []
    h = jnp.tanh(jnp.dot(x, raw["w_in"].T, precision=hi) + raw["b_in"])
    outs.append(jnp.dot(h, raw["w_out"][0].T, precision=hi) + raw["b_out"][0])
    for i in range(NUM_MATMULS):
        h = jnp.tanh(jnp.dot(h, raw["w_h"][i].T, precision=hi) + raw["b_h"][i])
        outs.append(jnp.dot(h, raw["w_out"][i + 1].T, precision=hi)
                    + raw["b_out"][i + 1])
    outs.append(jnp.dot(h, raw["w_out"][NUM_HEADS - 1].T, precision=hi)
                + raw["b_out"][NUM_HEADS - 1])
    return outs


if __name__ == "__main__":
    key = jax.random.PRNGKey(0)
    k_p, k_x, k_x2 = jax.random.split(key, 3)
    raw = init_params(k_p)
    packed = pack_params(raw)

    # Small batch (single 128-lane grid step).
    B = 8
    x = jax.random.normal(k_x, (B, INPUT_DIM), jnp.float32)
    outs = [jax.block_until_ready(o) for o in mlp_forward(x, packed)]
    refs = mlp_forward_ref(x, raw)
    for o, r in zip(outs, refs):
        assert o.shape == (B, OUTPUT_DIM)
        assert jnp.allclose(o, r, atol=5e-5, rtol=5e-5), float(jnp.max(jnp.abs(o - r)))

    # Larger, non-lane-multiple batch (exercises the 2-tile grid + lane padding).
    B2 = 300
    x2 = jax.random.normal(k_x2, (B2, INPUT_DIM), jnp.float32)
    outs2 = [jax.block_until_ready(o) for o in mlp_forward(x2, packed)]
    refs2 = mlp_forward_ref(x2, raw)
    for o, r in zip(outs2, refs2):
        assert o.shape == (B2, OUTPUT_DIM)
        assert jnp.allclose(o, r, atol=5e-5, rtol=5e-5), float(jnp.max(jnp.abs(o - r)))

    print("KERNEL_OK")
</pallas_src>

<mosaic_0001>
module attributes {stable_mosaic.version = 11 : i64} {
  func.func @mlp_kernel(%arg0: i32, %arg1: memref<1x128xf32, #tpu.memory_space<vmem>>, %arg2: memref<64x1xf32, #tpu.memory_space<vmem>>, %arg3: memref<64x1xf32, #tpu.memory_space<vmem>>, %arg4: memref<3x72x64xf32, #tpu.memory_space<vmem>>, %arg5: memref<3x64x1xf32, #tpu.memory_space<vmem>>, %arg6: memref<8x64xf32, #tpu.memory_space<vmem>>, %arg7: memref<5x1xf32, #tpu.memory_space<vmem>>, %arg8: memref<5x128xf32, #tpu.memory_space<vmem>>) attributes {dimension_semantics = [#tpu.dimension_semantics<parallel>], iteration_bounds = array<i64: 1>, scalar_prefetch = 0 : i64, scratch_operands = 0 : i64, tpu.core_type = #tpu.core_type<tc>, window_params = [{transform_indices = @transform_0, window_bounds = array<i64: 1, 128>}, {pipeline_mode = #tpu.pipeline_mode<synchronous>, transform_indices = @transform_1, window_bounds = array<i64: 64, 1>}, {pipeline_mode = #tpu.pipeline_mode<synchronous>, transform_indices = @transform_2, window_bounds = array<i64: 64, 1>}, {pipeline_mode = #tpu.pipeline_mode<synchronous>, transform_indices = @transform_3, window_bounds = array<i64: 3, 72, 64>}, {pipeline_mode = #tpu.pipeline_mode<synchronous>, transform_indices = @transform_4, window_bounds = array<i64: 3, 64, 1>}, {pipeline_mode = #tpu.pipeline_mode<synchronous>, transform_indices = @transform_5, window_bounds = array<i64: 8, 64>}, {pipeline_mode = #tpu.pipeline_mode<synchronous>, transform_indices = @transform_6, window_bounds = array<i64: 5, 1>}, {transform_indices = @transform_7, window_bounds = array<i64: 5, 128>}]} {
    %c0 = arith.constant 0 : index
    %c0_0 = arith.constant 0 : index
    %0 = vector.load %arg2[%c0, %c0_0] : memref<64x1xf32, #tpu.memory_space<vmem>>, vector<64x1xf32>
    %c0_1 = arith.constant 0 : index
    %c0_2 = arith.constant 0 : index
    %1 = vector.load %arg1[%c0_1, %c0_2] : memref<1x128xf32, #tpu.memory_space<vmem>>, vector<1x128xf32>
    %2 = vector.broadcast %0 : vector<64x1xf32> to vector<64x128xf32>
    %3 = vector.broadcast %1 : vector<1x128xf32> to vector<64x128xf32>
    %4 = arith.mulf %2, %3 : vector<64x128xf32>
    %c0_3 = arith.constant 0 : index
    %c0_4 = arith.constant 0 : index
    %5 = vector.load %arg3[%c0_3, %c0_4] : memref<64x1xf32, #tpu.memory_space<vmem>>, vector<64x1xf32>
    %6 = vector.broadcast %5 : vector<64x1xf32> to vector<64x128xf32>
    %7 = arith.addf %4, %6 : vector<64x128xf32>
    %8 = math.tanh %7 : vector<64x128xf32>
    %c0_5 = arith.constant 0 : index
    %c0_6 = arith.constant 0 : index
    %c0_7 = arith.constant 0 : index
    %9 = vector.load %arg4[%c0_5, %c0_6, %c0_7] : memref<3x72x64xf32, #tpu.memory_space<vmem>>, vector<1x72x64xf32>
    %10 = vector.shape_cast %9 : vector<1x72x64xf32> to vector<72x64xf32>
    %cst = arith.constant dense<0.000000e+00> : vector<72x128xf32>
    %11 = tpu.matmul %10, %8, %cst {dimension_numbers = #tpu.dot_dimension_numbers<[1], [0], [0], [1], [0, 0, 1, 1], [], []>} : vector<72x64xf32>, vector<64x128xf32>, vector<72x128xf32> -> vector<72x128xf32>
    %12 = vector.extract_strided_slice %11 {offsets = [64, 0], sizes = [1, 128], strides = [1, 1]} : vector<72x128xf32> to vector<1x128xf32>
    %c0_8 = arith.constant 0 : index
    %c0_9 = arith.constant 0 : index
    %13 = vector.load %arg7[%c0_8, %c0_9] : memref<5x1xf32, #tpu.memory_space<vmem>>, vector<1x1xf32>
    %14 = vector.broadcast %13 : vector<1x1xf32> to vector<1x128xf32>
    %15 = arith.addf %12, %14 : vector<1x128xf32>
    %c0_10 = arith.constant 0 : index
    %c0_11 = arith.constant 0 : index
    %16 = vector.load %arg8[%c0_10, %c0_11] : memref<5x128xf32, #tpu.memory_space<vmem>>, vector<1x128xf32>
    tpu.vector_store %arg8[%c0_10, %c0_11], %15 {strides = array<i32>} : memref<5x128xf32, #tpu.memory_space<vmem>>, vector<1x128xf32>,
    %17 = vector.extract_strided_slice %11 {offsets = [0, 0], sizes = [64, 128], strides = [1, 1]} : vector<72x128xf32> to vector<64x128xf32>
    %c0_12 = arith.constant 0 : index
    %c0_13 = arith.constant 0 : index
    %c0_14 = arith.constant 0 : index
    %18 = vector.load %arg5[%c0_12, %c0_13, %c0_14] : memref<3x64x1xf32, #tpu.memory_space<vmem>>, vector<1x64x1xf32>
    %19 = vector.shape_cast %18 : vector<1x64x1xf32> to vector<64x1xf32>
    %20 = vector.broadcast %19 : vector<64x1xf32> to vector<64x128xf32>
    %21 = arith.addf %17, %20 : vector<64x128xf32>
    %22 = math.tanh %21 : vector<64x128xf32>
    %c1 = arith.constant 1 : index
    %c0_15 = arith.constant 0 : index
    %c0_16 = arith.constant 0 : index
    %23 = vector.load %arg4[%c1, %c0_15, %c0_16] : memref<3x72x64xf32, #tpu.memory_space<vmem>>, vector<1x72x64xf32>
    %24 = vector.shape_cast %23 : vector<1x72x64xf32> to vector<72x64xf32>
    %cst_17 = arith.constant dense<0.000000e+00> : vector<72x128xf32>
    %25 = tpu.matmul %24, %22, %cst_17 {dimension_numbers = #tpu.dot_dimension_numbers<[1], [0], [0], [1], [0, 0, 1, 1], [], []>} : vector<72x64xf32>, vector<64x128xf32>, vector<72x128xf32> -> vector<72x128xf32>
    %26 = vector.extract_strided_slice %25 {offsets = [64, 0], sizes = [1, 128], strides = [1, 1]} : vector<72x128xf32> to vector<1x128xf32>
    %c1_18 = arith.constant 1 : index
    %c0_19 = arith.constant 0 : index
    %27 = vector.load %arg7[%c1_18, %c0_19] : memref<5x1xf32, #tpu.memory_space<vmem>>, vector<1x1xf32>
    %28 = vector.broadcast %27 : vector<1x1xf32> to vector<1x128xf32>
    %29 = arith.addf %26, %28 : vector<1x128xf32>
    %c1_20 = arith.constant 1 : index
    %c0_21 = arith.constant 0 : index
    %30 = vector.load %arg8[%c1_20, %c0_21] : memref<5x128xf32, #tpu.memory_space<vmem>>, vector<1x128xf32>
    tpu.vector_store %arg8[%c1_20, %c0_21], %29 {strides = array<i32>} : memref<5x128xf32, #tpu.memory_space<vmem>>, vector<1x128xf32>,
    %31 = vector.extract_strided_slice %25 {offsets = [0, 0], sizes = [64, 128], strides = [1, 1]} : vector<72x128xf32> to vector<64x128xf32>
    %c1_22 = arith.constant 1 : index
    %c0_23 = arith.constant 0 : index
    %c0_24 = arith.constant 0 : index
    %32 = vector.load %arg5[%c1_22, %c0_23, %c0_24] : memref<3x64x1xf32, #tpu.memory_space<vmem>>, vector<1x64x1xf32>
    %33 = vector.shape_cast %32 : vector<1x64x1xf32> to vector<64x1xf32>
    %34 = vector.broadcast %33 : vector<64x1xf32> to vector<64x128xf32>
    %35 = arith.addf %31, %34 : vector<64x128xf32>
    %36 = math.tanh %35 : vector<64x128xf32>
    %c2 = arith.constant 2 : index
    %c0_25 = arith.constant 0 : index
    %c0_26 = arith.constant 0 : index
    %37 = vector.load %arg4[%c2, %c0_25, %c0_26] : memref<3x72x64xf32, #tpu.memory_space<vmem>>, vector<1x72x64xf32>
    %38 = vector.shape_cast %37 : vector<1x72x64xf32> to vector<72x64xf32>
    %cst_27 = arith.constant dense<0.000000e+00> : vector<72x128xf32>
    %39 = tpu.matmul %38, %36, %cst_27 {dimension_numbers = #tpu.dot_dimension_numbers<[1], [0], [0], [1], [0, 0, 1, 1], [], []>} : vector<72x64xf32>, vector<64x128xf32>, vector<72x128xf32> -> vector<72x128xf32>
    %40 = vector.extract_strided_slice %39 {offsets = [64, 0], sizes = [1, 128], strides = [1, 1]} : vector<72x128xf32> to vector<1x128xf32>
    %c2_28 = arith.constant 2 : index
    %c0_29 = arith.constant 0 : index
    %41 = vector.load %arg7[%c2_28, %c0_29] : memref<5x1xf32, #tpu.memory_space<vmem>>, vector<1x1xf32>
    %42 = vector.broadcast %41 : vector<1x1xf32> to vector<1x128xf32>
    %43 = arith.addf %40, %42 : vector<1x128xf32>
    %c2_30 = arith.constant 2 : index
    %c0_31 = arith.constant 0 : index
    %44 = vector.load %arg8[%c2_30, %c0_31] : memref<5x128xf32, #tpu.memory_space<vmem>>, vector<1x128xf32>
    tpu.vector_store %arg8[%c2_30, %c0_31], %43 {strides = array<i32>} : memref<5x128xf32, #tpu.memory_space<vmem>>, vector<1x128xf32>,
    %45 = vector.extract_strided_slice %39 {offsets = [0, 0], sizes = [64, 128], strides = [1, 1]} : vector<72x128xf32> to vector<64x128xf32>
    %c2_32 = arith.constant 2 : index
    %c0_33 = arith.constant 0 : index
    %c0_34 = arith.constant 0 : index
    %46 = vector.load %arg5[%c2_32, %c0_33, %c0_34] : memref<3x64x1xf32, #tpu.memory_space<vmem>>, vector<1x64x1xf32>
    %47 = vector.shape_cast %46 : vector<1x64x1xf32> to vector<64x1xf32>
    %48 = vector.broadcast %47 : vector<64x1xf32> to vector<64x128xf32>
    %49 = arith.addf %45, %48 : vector<64x128xf32>
    %50 = math.tanh %49 : vector<64x128xf32>
    %c0_35 = arith.constant 0 : index
    %c0_36 = arith.constant 0 : index
    %51 = vector.load %arg6[%c0_35, %c0_36] : memref<8x64xf32, #tpu.memory_space<vmem>>, vector<8x64xf32>
    %cst_37 = arith.constant dense<0.000000e+00> : vector<8x128xf32>
    %52 = tpu.matmul %51, %50, %cst_37 {dimension_numbers = #tpu.dot_dimension_numbers<[1], [0], [0], [1], [0, 0, 1, 1], [], []>} : vector<8x64xf32>, vector<64x128xf32>, vector<8x128xf32> -> vector<8x128xf32>
    %53 = vector.extract_strided_slice %52 {offsets = [0, 0], sizes = [2, 128], strides = [1, 1]} : vector<8x128xf32> to vector<2x128xf32>
    %c3 = arith.constant 3 : index
    %c0_38 = arith.constant 0 : index
    %54 = vector.load %arg7[%c3, %c0_38] : memref<5x1xf32, #tpu.memory_space<vmem>>, vector<2x1xf32>
    %55 = vector.broadcast %54 : vector<2x1xf32> to vector<2x128xf32>
    %56 = arith.addf %53, %55 : vector<2x128xf32>
    %c3_39 = arith.constant 3 : index
    %c0_40 = arith.constant 0 : index
    %57 = vector.load %arg8[%c3_39, %c0_40] : memref<5x128xf32, #tpu.memory_space<vmem>>, vector<2x128xf32>
    tpu.vector_store %arg8[%c3_39, %c0_40], %56 {strides = array<i32>} : memref<5x128xf32, #tpu.memory_space<vmem>>, vector<2x128xf32>,
    return
  }
  func.func @transform_0(%arg0: i32) -> (i32, i32) {
    %c0_i32 = arith.constant 0 : i32
    %c0_i32_0 = arith.constant 0 : i32
    return %c0_i32, %arg0 : i32, i32
  }
  func.func @transform_1(%arg0: i32) -> (i32, i32) {
    %c0_i32 = arith.constant 0 : i32
    %c0_i32_0 = arith.constant 0 : i32
    %c0_i32_1 = arith.constant 0 : i32
    return %c0_i32, %c0_i32_0 : i32, i32
  }
  func.func @transform_2(%arg0: i32) -> (i32, i32) {
    %c0_i32 = arith.constant 0 : i32
    %c0_i32_0 = arith.constant 0 : i32
    %c0_i32_1 = arith.constant 0 : i32
    return %c0_i32, %c0_i32_0 : i32, i32
  }
  func.func @transform_3(%arg0: i32) -> (i32, i32, i32) {
    %c0_i32 = arith.constant 0 : i32
    %c0_i32_0 = arith.constant 0 : i32
    %c0_i32_1 = arith.constant 0 : i32
    %c0_i32_2 = arith.constant 0 : i32
    return %c0_i32, %c0_i32_0, %c0_i32_1 : i32, i32, i32
  }
  func.func @transform_4(%arg0: i32) -> (i32, i32, i32) {
    %c0_i32 = arith.constant 0 : i32
    %c0_i32_0 = arith.constant 0 : i32
    %c0_i32_1 = arith.constant 0 : i32
    %c0_i32_2 = arith.constant 0 : i32
    return %c0_i32, %c0_i32_0, %c0_i32_1 : i32, i32, i32
  }
  func.func @transform_5(%arg0: i32) -> (i32, i32) {
    %c0_i32 = arith.constant 0 : i32
    %c0_i32_0 = arith.constant 0 : i32
    %c0_i32_1 = arith.constant 0 : i32
    return %c0_i32, %c0_i32_0 : i32, i32
  }
  func.func @transform_6(%arg0: i32) -> (i32, i32) {
    %c0_i32 = arith.constant 0 : i32
    %c0_i32_0 = arith.constant 0 : i32
    %c0_i32_1 = arith.constant 0 : i32
    return %c0_i32, %c0_i32_0 : i32, i32
  }
  func.func @transform_7(%arg0: i32) -> (i32, i32) {
    %c0_i32 = arith.constant 0 : i32
    %c0_i32_0 = arith.constant 0 : i32
    return %c0_i32, %arg0 : i32, i32
  }
}

</mosaic_0001>

<bundles_post_ra>
// kernel: _mlp_forward_packed.1
= control target key start
LH: loop header
LB: loop body
LE: loop exit
PB: predicated region body
PF: predicated region fallthrough
CT: control target
= control target key end

     0   :  { %v1288_v2 = vmov 0   ;;  %s1714_s0 = inlined_call_operand.vmem [shape: f32[1,128], index: 0, kind: input, shape index: {}]   ;;  %s1715_s1 = inlined_call_operand.vmem [shape: f32[64,1], index: 1, kind: input, shape index: {}]   ;;  %s1716_s2 = inlined_call_operand.vmem [shape: f32[64,1], index: 2, kind: input, shape index: {}]   ;;  %s1717_s3 = inlined_call_operand.vmem [shape: f32[3,72,64], index: 3, kind: input, shape index: {}]   ;;  %s1718_s4 = inlined_call_operand.vmem [shape: f32[3,64,1], index: 4, kind: input, shape index: {}]   ;;  %s1719_s5 = inlined_call_operand.vmem [shape: f32[8,64], index: 5, kind: input, shape index: {}]   ;;  %s1720_s6 = inlined_call_operand.vmem [shape: f32[5,1], index: 6, kind: input, shape index: {}]   ;;  %s1721_s7 = inlined_call_operand.hbm [shape: f32[5,128], index: 7, kind: output, shape index: {}]  }
   0x1   :  { %v97_v0 = vld [vmem:[%s1716_s2 + $0x38] sm:$0xff]  ;;  %1201 = vset.pattern.permute.xlu1 %v1288_v2  ;;  %1200 = vset.pattern.permute.xlu0 %v1288_v2  ;;  %v33_v3 = vld [vmem:[%s1715_s1 + $0x30] sm:$0xff]  ;;  %v32_v4 = vld [vmem:[%s1715_s1 + $0x28] sm:$0xff] }
   0x2   :  { %v34_v1 = vld [vmem:[%s1715_s1 + $0x38] sm:$0xff]  ;;  %135 = vperm.xlu1 %1201, %v97_v0   ;;  %v96_v5 = vld [vmem:[%s1716_s2 + $0x30] sm:$0xff]  ;;  %v31_v6 = vld [vmem:[%s1715_s1 + $0x20] sm:$0xff] }
   0x3   :  { %73 = vperm.xlu0 %1200, %v34_v1   ;;  %v95_v7 = vld [vmem:[%s1716_s2 + $0x28] sm:$0xff]  ;;  %v30_v8 = vld [vmem:[%s1715_s1 + $0x18] sm:$0xff]  ;;  %v94_v9 = vld [vmem:[%s1716_s2 + $0x20] sm:$0xff] }
   0x4   :  { %v29_v10 = vld [vmem:[%s1715_s1 + $0x10] sm:$0xff] }
   0x6   :  { %63 = vperm.xlu1 %1201, %v32_v4  }
   0x7   :  { %68 = vperm.xlu0 %1200, %v33_v3  }
   0xa   :  { %58 = vperm.xlu1 %1201, %v31_v6  }
   0xb   :  { %130 = vperm.xlu0 %1200, %v96_v5  }
   0xe   :  { %53 = vperm.xlu1 %1201, %v30_v8  }
   0xf   :  { %125 = vperm.xlu0 %1200, %v95_v7  }
  0x10   :  { %12 = vsyncpa [#allocation3], 0  ;;  %v1289_v11 = vmov 0.0   ;;  %v93_v12 = vld [vmem:[%s1716_s2 + $0x18] sm:$0xff]  ;;  %v28_v13 = vld [vmem:[%s1715_s1 + $0x8] sm:$0xff]  ;;  %vm1290_vm0 = vmmov 0  }
  0x11   :  { %1032 = vmatprep.subr.mxu0 %v1289_v11  ;;  %1180 = vmatprep.subr.mxu1 %v1289_v11  ;;  %v92_v14 = vld [vmem:[%s1716_s2 + $0x10] sm:$0xff]  ;;  %v27_v15 = vld [vmem:[%s1715_s1] sm:$0xff]  ;;  %v91_v16 = vld [vmem:[%s1716_s2 + $0x8] sm:$0xff]  ;;  %vm163_vm1 = vcmask 523264   ;;  %s1291_s15 = smov [#allocation2]  }
  0x12   :  { %48 = vperm.xlu1 %1201, %v29_v10   ;;  %v90_v17 = vld [vmem:[%s1716_s2] sm:$0xff]  ;;  %v316_v18 = vld [vmem:[%s1718_s4 + $0x38] sm:$0xff]  ;;  %v315_v19 = vld [vmem:[%s1718_s4 + $0x30] sm:$0xff]  ;;  %1048 = vmatprep.mubr.msk.f32.mxu0 %vm1290_vm0, %v1289_v11 }
  0x13   :  { %120 = vperm.xlu0 %1200, %v94_v9   ;;  %v314_v20 = vld [vmem:[%s1718_s4 + $0x28] sm:$0xff]  ;;  %v313_v21 = vld [vmem:[%s1718_s4 + $0x20] sm:$0xff]  ;;  %v312_v22 = vld [vmem:[%s1718_s4 + $0x18] sm:$0xff]  ;;  %1063 = vmatprep.mubr.msk.f32.mxu1 %vm1290_vm0, %v1289_v11 }
  0x14   :  { %v311_v23 = vld [vmem:[%s1718_s4 + $0x10] sm:$0xff]  ;;  %v310_v24 = vld [vmem:[%s1718_s4 + $0x8] sm:$0xff]  ;;  %v309_v25 = vld [vmem:[%s1718_s4] sm:$0xff] }
  0x15   :  { %v944_v26 = vld [vmem:[%s1718_s4 + $0x78] sm:$0xff]  ;;  %v943_v27 = vld [vmem:[%s1718_s4 + $0x70] sm:$0xff]  ;;  %v942_v28 = vld [vmem:[%s1718_s4 + $0x68] sm:$0xff] }
  0x16   :  { %43 = vperm.xlu1 %1201, %v28_v13   ;;  %v941_v29 = vld [vmem:[%s1718_s4 + $0x60] sm:$0xff]  ;;  %v940_v30 = vld [vmem:[%s1718_s4 + $0x58] sm:$0xff]  ;;  %v939_v31 = vld [vmem:[%s1718_s4 + $0x50] sm:$0xff] }
  0x17   :  { %115 = vperm.xlu0 %1200, %v93_v12   ;;  %v938_v32 = vld [vmem:[%s1718_s4 + $0x48] sm:$0xff]  ;;  %v937_v33 = vld [vmem:[%s1718_s4 + $0x40] sm:$0xff]  ;;  %v970_v34 = vld [vmem:[%s1718_s4 + $0xb8] sm:$0xff] }
  0x18   :  { %v969_v35 = vld [vmem:[%s1718_s4 + $0xb0] sm:$0xff]  ;;  %v968_v36 = vld [vmem:[%s1718_s4 + $0xa8] sm:$0xff]  ;;  %v967_v37 = vld [vmem:[%s1718_s4 + $0xa0] sm:$0xff] }
  0x19   :  { %v966_v38 = vld [vmem:[%s1718_s4 + $0x98] sm:$0xff]  ;;  %v965_v39 = vld [vmem:[%s1718_s4 + $0x90] sm:$0xff]  ;;  %v964_v40 = vld [vmem:[%s1718_s4 + $0x88] sm:$0xff] }
  0x1a   :  { %38 = vperm.xlu1 %1201, %v27_v15   ;;  %v963_v41 = vld [vmem:[%s1718_s4 + $0x80] sm:$0xff] }
  0x1b   :  { %110 = vperm.xlu0 %1200, %v92_v14   ;;  %v301_v42 = vld [vmem:[%s1720_s6] sm:$0x1]  ;;  %v520_v43 = vld [vmem:[%s1720_s6 + $0x1] sm:$0x1]  ;;  %v740_v44 = vld [vmem:[%s1720_s6 + $0x2] sm:$0x1] }
  0x1c   :  { %v887_v45 = vld [vmem:[%s1720_s6 + $0x3] sm:$0x3]  ;;  %v909_v46 = vld [vmem:[%s1714_s0] ss:$0 sm:$0xff]  ;;  %s901_s0 = sshll.u32 %s1291_s15, 4  ;;  %s902_s0 = int_to_ptr.vmem [resolvable:$true] %s901_s0 }
  0x1d   :  { %s1266_s6 = scalar_lea.vmem %s902_s0, 128  ;;  %p1271_p1 = scmp.lt.s32.totalorder %s902_s0, %s902_s0 }
  0x1e   :  { %100 = vperm.xlu1 %1201, %v90_v17   ;;  %p1267_p0 = scmp.ne.s32.totalorder %s902_s0, %s1266_s6  ;;  %p1272_p2 = scmp.lt.s32.totalorder %s1266_s6, %s1266_s6 }
  0x1f   :  { %105 = vperm.xlu0 %1200, %v91_v16  }
  0x20   :  { %p1273_p3 = por %p1272_p2, %p1271_p1 }
  0x22   :  { %349 = vperm.xlu1 %1201, %v315_v19   ;;  %p1274_p4 = pnand %p1273_p3, %p1267_p0 }
  0x23   :  { %354 = vperm.xlu0 %1200, %v316_v18  }
  0x26   :  { %339 = vperm.xlu1 %1201, %v313_v21  }
  0x27   :  { %344 = vperm.xlu0 %1200, %v314_v20  }
  0x2a   :  { %329 = vperm.xlu1 %1201, %v311_v23   ;;  %v154_v23 = vld [vmem:[%s1717_s3] sm:$0xff] }
  0x2b   :  { %334 = vperm.xlu0 %1200, %v312_v22  }
  0x2e   :  { %319 = vperm.xlu1 %1201, %v309_v25  }
  0x2f   :  { %324 = vperm.xlu0 %1200, %v310_v24   ;;  %v159_v24 = vld [vmem:[%s1717_s3 + $0x28] sm:$0xff] }
  0x32   :  { %569 = vperm.xlu1 %1201, %v943_v27   ;;  %v160_v27 = vld [vmem:[%s1717_s3 + $0x30] sm:$0xff] }
  0x33   :  { %574 = vperm.xlu0 %1200, %v944_v26   ;;  %v155_v26 = vld [vmem:[%s1717_s3 + $0x8] sm:$0xff] }
  0x36   :  { %559 = vperm.xlu1 %1201, %v941_v29   ;;  %v161_v29 = vld [vmem:[%s1717_s3 + $0x38] sm:$0xff] }
  0x37   :  { %564 = vperm.xlu0 %1200, %v942_v28   ;;  %v156_v28 = vld [vmem:[%s1717_s3 + $0x10] sm:$0xff] }
  0x3a   :  { %549 = vperm.xlu1 %1201, %v939_v31   ;;  %v162_v31 = vld [vmem:[%s1717_s3 + $0x40] sm:$0xff] }
  0x3b   :  { %554 = vperm.xlu0 %1200, %v940_v30   ;;  %v157_v30 = vld [vmem:[%s1717_s3 + $0x18] sm:$0xff] }
  0x3e   :  { %539 = vperm.xlu1 %1201, %v937_v33  }
  0x3f   :  { %544 = vperm.xlu0 %1200, %v938_v32   ;;  %v158_v32 = vld [vmem:[%s1717_s3 + $0x20] sm:$0xff] }
  0x42   :  { %789 = vperm.xlu1 %1201, %v969_v35  }
  0x43   :  { %794 = vperm.xlu0 %1200, %v970_v34  }
  0x46   :  { %779 = vperm.xlu1 %1201, %v967_v37  }
  0x47   :  { %784 = vperm.xlu0 %1200, %v968_v36  }
  0x4a   :  { %769 = vperm.xlu1 %1201, %v965_v39  }
  0x4b   :  { %774 = vperm.xlu0 %1200, %v966_v38  }
  0x4e   :  { %759 = vperm.xlu1 %1201, %v963_v41  }
  0x4f   :  { %764 = vperm.xlu0 %1200, %v964_v40  }
  0x52   :  { %523 = vperm.xlu1 %1201, %v520_v43  }
  0x53   :  { %304 = vperm.xlu0 %1200, %v301_v42  }
  0x56   :  { %890 = vperm.xlu1 %1201, %v887_v45  }
  0x57   :  { %743 = vperm.xlu0 %1200, %v740_v44  }
  0x7d   :  { %v136_v47 = vpop.permute.xlu1 %135 }
  0x7e   :  { %v74_v48 = vpop.permute.xlu0 %73 }
  0x7f   :  { %v89_v49 = vmul.f32 %v909_v46, %v74_v48 }
  0x81   :  { %v145_v50 = vadd.f32 %v136_v47, %v89_v49  ;;  %v64_v52 = vpop.permute.xlu1 %63 }
  0x82   :  { %v69_v51 = vpop.permute.xlu0 %68  ;;  %v87_v57 = vmul.f32 %v909_v46, %v64_v52 }
  0x83   :  { %1202 = vtanh.f32 %v145_v50  ;;  %v88_v53 = vmul.f32 %v909_v46, %v69_v51 }
  0x85   :  { %v59_v55 = vpop.permute.xlu1 %58 }
  0x86   :  { %v131_v54 = vpop.permute.xlu0 %130  ;;  %v86_v61 = vmul.f32 %v909_v46, %v59_v55 }
  0x87   :  { %v144_v56 = vadd.f32 %v131_v54, %v88_v53 }
  0x89   :  { %1204 = vtanh.f32 %v144_v56  ;;  %v54_v59 = vpop.permute.xlu1 %53 }
  0x8a   :  { %v126_v58 = vpop.permute.xlu0 %125  ;;  %v85_v2 = vmul.f32 %v909_v46, %v54_v59 }
  0x8b   :  { %v143_v60 = vadd.f32 %v126_v58, %v87_v57 }
  0x8d   :  { %1206 = vtanh.f32 %v143_v60  ;;  %v49_v63 = vpop.permute.xlu1 %48 }
  0x8e   :  { %v121_v62 = vpop.permute.xlu0 %120  ;;  %v84_v6 = vmul.f32 %v909_v46, %v49_v63 }
  0x8f   :  { %v142_v0 = vadd.f32 %v121_v62, %v86_v61 }
  0x90   :  { %v1203_v1 = vpop.eup %1202 }
  0x91   :  { %1208 = vtanh.f32 %v142_v0  ;;  %1033 = vmatpush3.msra.mxu0 %v1203_v1  ;;  %1188 = vmatpush3.msra.mxu1 %v1203_v1  ;;  %v44_v4 = vpop.permute.xlu1 %43 }
  0x92   :  { %v116_v3 = vpop.permute.xlu0 %115  ;;  %1034 = vmatprep.subr.mxu0 %v1289_v11  ;;  %1181 = vmatprep.subr.mxu1 %v1289_v11  ;;  %v83_v12 = vmul.f32 %v909_v46, %v44_v4 }
  0x93   :  { %v141_v5 = vadd.f32 %v116_v3, %v85_v2 }
  0x95   :  { %1210 = vtanh.f32 %v141_v5  ;;  %v39_v9 = vpop.permute.xlu1 %38 }
  0x96   :  { %v1205_v7 = vpop.eup %1204  ;;  %v111_v8 = vpop.permute.xlu0 %110  ;;  %v82_v13 = vmul.f32 %v909_v46, %v39_v9 }
  0x97   :  { %v140_v10 = vadd.f32 %v111_v8, %v84_v6  ;;  %1035 = vmatpush3.msra.mxu0 %v1205_v7  ;;  %1189 = vmatpush3.msra.mxu1 %v1205_v7 }
  0x98   :  { %1036 = vmatprep.subr.mxu0 %v1289_v11  ;;  %1182 = vmatprep.subr.mxu1 %v1289_v11 }
  0x99   :  { %1212 = vtanh.f32 %v140_v10  ;;  %v101_v16 = vpop.permute.xlu1 %100 }
  0x9a   :  { %v1207_v14 = vpop.eup %1206  ;;  %v106_v15 = vpop.permute.xlu0 %105  ;;  %v138_v18 = vadd.f32 %v101_v16, %v82_v13 }
  0x9b   :  { %v139_v17 = vadd.f32 %v106_v15, %v83_v12  ;;  %1037 = vmatpush3.msra.mxu0 %v1207_v14  ;;  %1190 = vmatpush3.msra.mxu1 %v1207_v14 }
  0x9c   :  { %1038 = vmatprep.subr.mxu0 %v1289_v11  ;;  %1183 = vmatprep.subr.mxu1 %v1289_v11 }
  0x9d   :  { %1214 = vtanh.f32 %v139_v17  ;;  %v350_v48 = vpop.permute.xlu1 %349 }
  0x9e   :  { %v1209_v19 = vpop.eup %1208  ;;  %1216 = vtanh.f32 %v138_v18  ;;  %v355_v33 = vpop.permute.xlu0 %354 }
  0x9f   :  { %1039 = vmatpush3.msra.mxu0 %v1209_v19  ;;  %1191 = vmatpush3.msra.mxu1 %v1209_v19 }
  0xa0   :  { %1040 = vmatprep.subr.mxu0 %v1289_v11  ;;  %1184 = vmatprep.subr.mxu1 %v1289_v11 }
  0xa1   :  { %v340_v56 = vpop.permute.xlu1 %339 }
  0xa2   :  { %v1211_v20 = vpop.eup %1210  ;;  %v345_v34 = vpop.permute.xlu0 %344 }
  0xa3   :  { %1041 = vmatpush3.msra.mxu0 %v1211_v20  ;;  %1192 = vmatpush3.msra.mxu1 %v1211_v20 }
  0xa4   :  { %1042 = vmatprep.subr.mxu0 %v1289_v11  ;;  %1185 = vmatprep.subr.mxu1 %v1289_v11 }
  0xa5   :  { %v330_v4 = vpop.permute.xlu1 %329 }
  0xa6   :  { %v1213_v21 = vpop.eup %1212  ;;  %v335_v35 = vpop.permute.xlu0 %334 }
  0xa7   :  { %1043 = vmatpush3.msra.mxu0 %v1213_v21  ;;  %1193 = vmatpush3.msra.mxu1 %v1213_v21  ;;  %v919_v21 = vld [vmem:[%s1717_s3 + $0x48] sm:$0xff] }
  0xa8   :  { %1044 = vmatprep.subr.mxu0 %v1289_v11  ;;  %1186 = vmatprep.subr.mxu1 %v1289_v11 }
  0xa9   :  { %v320_v12 = vpop.permute.xlu1 %319 }
  0xaa   :  { %v1215_v22 = vpop.eup %1214  ;;  %v325_v36 = vpop.permute.xlu0 %324 }
  0xab   :  { %1045 = vmatpush3.msra.mxu0 %v1215_v22  ;;  %1194 = vmatpush3.msra.mxu1 %v1215_v22  ;;  %v1217_v25 = vpop.eup %1216 }
  0xac   :  { %1046 = vmatprep.subr.mxu0 %v1289_v11  ;;  %1187 = vmatprep.subr.mxu1 %v1289_v11 }
  0xad   :  { %1047 = vmatpush3.msra.mxu0 %v1217_v25  ;;  %1195 = vmatpush3.msra.mxu1 %v1217_v25  ;;  %v922_v25 = vld [vmem:[%s1717_s3 + $0x60] sm:$0xff] }
  0xae   :  { %1049 = vmatmul.mubr.msk.f32.vlgmr.msra.gmra.mxu0 %vm163_vm1, %v154_v23  ;;  %1064 = vmatmul.mubr.msk.f32.vlgmr.msra.gmra.mxu1 %vm163_vm1, %v159_v24  ;;  %v1543_v37 = vpop.permute.xlu0 %574  ;;  %v920_v23 = vld [vmem:[%s1717_s3 + $0x50] sm:$0xff]  ;;  %v921_v24 = vld [vmem:[%s1717_s3 + $0x58] sm:$0xff] }
  0xaf   :  { %1051 = vmatprep.mubr.msk.f32.mxu0 %vm1290_vm0, %v1289_v11  ;;  %1066 = vmatprep.mubr.msk.f32.mxu1 %vm1290_vm0, %v1289_v11 }
  0xb0   :  { %1075 = vmatprep.subr.mxu1 %v1289_v11  ;;  %1118 = vmatprep.subr.mxu0 %v1289_v11 }
  0xb2   :  { %1052 = vmatmul.mubr.msk.f32.gmra.mxu0 %vm163_vm1, %v155_v26  ;;  %1067 = vmatmul.mubr.msk.f32.gmra.mxu1 %vm163_vm1, %v160_v27  ;;  %v1545_v38 = vpop.permute.xlu0 %564  ;;  %v923_v26 = vld [vmem:[%s1717_s3 + $0x68] sm:$0xff]  ;;  %v924_v27 = vld [vmem:[%s1717_s3 + $0x70] sm:$0xff] }
  0xb3   :  { %1054 = vmatprep.mubr.msk.f32.mxu0 %vm1290_vm0, %v1289_v11  ;;  %1069 = vmatprep.mubr.msk.f32.mxu1 %vm1290_vm0, %v1289_v11 }
  0xb6   :  { %1055 = vmatmul.mubr.msk.f32.gmra.mxu0 %vm163_vm1, %v156_v28  ;;  %1070 = vmatmul.mubr.msk.f32.gmra.mxu1 %vm163_vm1, %v161_v29  ;;  %v1547_v39 = vpop.permute.xlu0 %554  ;;  %v925_v28 = vld [vmem:[%s1717_s3 + $0x78] sm:$0xff]  ;;  %v926_v29 = vld [vmem:[%s1717_s3 + $0x80] sm:$0xff] }
  0xb7   :  { %1057 = vmatprep.mubr.msk.f32.mxu0 %vm1290_vm0, %v1289_v11  ;;  %1072 = vmatprep.mubr.msk.f32.mxu1 %vm1290_vm0, %v1289_v11 }
  0xba   :  { %1058 = vmatmul.mubr.msk.f32.gmra.mxu0 %vm163_vm1, %v157_v30  ;;  %1073 = vmatmul.mubr.msk.f32.gmra.mxu1 %vm163_vm1, %v162_v31  ;;  %v1549_v40 = vpop.permute.xlu0 %544  ;;  %v927_v30 = vld [vmem:[%s1717_s3 + $0x88] sm:$0xff]  ;;  %v570_v31 = vpop.permute.xlu1 %569 }
  0xbb   :  { %1060 = vmatprep.mubr.msk.f32.mxu0 %vm1290_vm0, %v1289_v11  ;;  %1091 = vmatprep.mubr.msk.f32.mxu1 %vm1290_vm0, %v1289_v11 }
  0xbe   :  { %1061 = vmatmul.mubr.msk.f32.gmra.mxu0 %vm163_vm1, %v158_v32  ;;  %v1551_v41 = vpop.permute.xlu0 %794  ;;  %v560_v32 = vpop.permute.xlu1 %559 }
  0xbf   :  { %1134 = vmatprep.mubr.msk.f32.mxu0 %vm1290_vm0, %v1289_v11 }
  0xc2   :  { %v1553_v42 = vpop.permute.xlu0 %784 }
  0xc6   :  { %v1555_v43 = vpop.permute.xlu0 %774 }
  0xca   :  { %v1557_v51 = vpop.permute.xlu0 %764 }
  0xce   :  { %v305_v61 = vpop.permute.xlu0 %304 }
 0x16e   :  { %v257_v44 = vpop.f32.mrf.mxu0  ;;  %v282_v45 = vpop.f32.mrf.mxu1 }
 0x16f   :  { %v362_v62 = vadd.f32 %v345_v34, %v282_v45  ;;  %v357_v13 = vadd.f32 %v320_v12, %v257_v44 }
 0x170   :  { %v1050_v46 = vpop.f32.mrf.mxu0  ;;  %v1065_v47 = vpop.f32.mrf.mxu1 }
 0x172   :  { %v262_v49 = vpop.f32.mrf.mxu0  ;;  %v287_v50 = vpop.f32.mrf.mxu1 }
 0x173   :  { %v363_v58 = vadd.f32 %v350_v48, %v287_v50  ;;  %v358_v10 = vadd.f32 %v325_v36, %v262_v49 }
 0x174   :  { %v1053_v52 = vpop.f32.mrf.mxu0  ;;  %v1068_v53 = vpop.f32.mrf.mxu1 }
 0x176   :  { %v267_v54 = vpop.f32.mrf.mxu0  ;;  %v292_v55 = vpop.f32.mrf.mxu1 }
 0x177   :  { %v364_v57 = vadd.f32 %v355_v33, %v292_v55  ;;  %v359_v9 = vadd.f32 %v330_v4, %v267_v54  ;;  %v550_v33 = vpop.permute.xlu1 %549 }
 0x178   :  { %v1056_v59 = vpop.f32.mrf.mxu0  ;;  %v1071_v60 = vpop.f32.mrf.mxu1 }
 0x179   :  { %1218 = vtanh.f32 %v364_v57 }
 0x17a   :  { %v272_v63 = vpop.f32.mrf.mxu0  ;;  %v297_v0 = vpop.f32.mrf.mxu1  ;;  %1220 = vtanh.f32 %v363_v58 }
 0x17b   :  { %v307_v1 = vadd.f32 %v305_v61, %v297_v0  ;;  %1222 = vtanh.f32 %v362_v62  ;;  %v360_v6 = vadd.f32 %v335_v35, %v272_v63  ;;  %v540_v35 = vpop.permute.xlu1 %539 }
 0x17c   :  { %v1059_v2 = vpop.f32.mrf.mxu0  ;;  %v1074_v3 = vpop.f32.mrf.mxu1 }
 0x17d   :  { %308 = vst [vmem:[#allocation2] sm:$0x1] %v307_v1 }
 0x17e   :  { %v277_v5 = vpop.f32.mrf.mxu0 }
 0x17f   :  { %v361_v7 = vadd.f32 %v340_v56, %v277_v5  ;;  %v1621_v46 = vpop.permute.xlu1 %789 }
 0x180   :  { %v1062_v8 = vpop.f32.mrf.mxu0 }
 0x181   :  { %1224 = vtanh.f32 %v361_v7 }
 0x182   :  { %1226 = vtanh.f32 %v360_v6 }
 0x183   :  { %1228 = vtanh.f32 %v359_v9  ;;  %v1623_v50 = vpop.permute.xlu1 %779 }
 0x184   :  { %1230 = vtanh.f32 %v358_v10 }
 0x185   :  { %1232 = vtanh.f32 %v357_v13 }
 0x186   :  { %v1219_v14 = vpop.eup %1218 }
 0x187   :  { %1076 = vmatpush3.msra.mxu1 %v1219_v14  ;;  %v1221_v15 = vpop.eup %1220  ;;  %v1625_v55 = vpop.permute.xlu1 %769 }
 0x188   :  { %1077 = vmatprep.subr.mxu1 %v1289_v11  ;;  %v1223_v16 = vpop.eup %1222 }
 0x189   :  { %1078 = vmatpush3.msra.mxu1 %v1221_v15  ;;  %v945_v15 = vld [vmem:[%s1717_s3 + $0x90] sm:$0xff] }
 0x18a   :  { %1079 = vmatprep.subr.mxu1 %v1289_v11 }
 0x18b   :  { %1080 = vmatpush3.msra.mxu1 %v1223_v16  ;;  %v1627_v59 = vpop.permute.xlu1 %759 }
 0x18c   :  { %1081 = vmatprep.subr.mxu1 %v1289_v11 }
 0x18e   :  { %v1225_v17 = vpop.eup %1224 }
 0x18f   :  { %1082 = vmatpush3.msra.mxu1 %v1225_v17  ;;  %v1227_v18 = vpop.eup %1226  ;;  %v524_v2 = vpop.permute.xlu1 %523  ;;  %v946_v17 = vld [vmem:[%s1717_s3 + $0x98] sm:$0xff] }
 0x190   :  { %1083 = vmatprep.subr.mxu1 %v1289_v11  ;;  %v1229_v19 = vpop.eup %1228 }
 0x191   :  { %1084 = vmatpush3.msra.mxu1 %v1227_v18  ;;  %v1231_v20 = vpop.eup %1230  ;;  %v947_v18 = vld [vmem:[%s1717_s3 + $0xa0] sm:$0xff] }
 0x192   :  { %1085 = vmatprep.subr.mxu1 %v1289_v11  ;;  %v1233_v22 = vpop.eup %1232 }
 0x193   :  { %1086 = vmatpush3.msra.mxu1 %v1229_v19  ;;  %v948_v19 = vld [vmem:[%s1717_s3 + $0xa8] sm:$0xff] }
 0x194   :  { %1087 = vmatprep.subr.mxu1 %v1289_v11 }
 0x195   :  { %1088 = vmatpush3.msra.mxu1 %v1231_v20  ;;  %v949_v20 = vld [vmem:[%s1717_s3 + $0xb0] sm:$0xff] }
 0x196   :  { %1089 = vmatprep.subr.mxu1 %v1289_v11 }
 0x197   :  { %1090 = vmatpush3.msra.mxu1 %v1233_v22  ;;  %v951_v22 = vld [vmem:[%s1717_s3 + $0xc0] sm:$0xff] }
 0x198   :  { %1092 = vmatmul.mubr.msk.f32.vlgmr.msra.gmra.mxu1 %vm163_vm1, %v919_v21  ;;  %1161 = vmatprep.subr.mxu1 %v1289_v11  ;;  %v950_v21 = vld [vmem:[%s1717_s3 + $0xb8] sm:$0xff] }
 0x199   :  { %1094 = vmatprep.mubr.msk.f32.mxu1 %vm1290_vm0, %v1289_v11 }
 0x19c   :  { %1095 = vmatmul.mubr.msk.f32.gmra.mxu1 %vm163_vm1, %v920_v23  ;;  %v952_v23 = vld [vmem:[%s1717_s3 + $0xc8] sm:$0xff] }
 0x19d   :  { %1097 = vmatprep.mubr.msk.f32.mxu1 %vm1290_vm0, %v1289_v11 }
 0x1a0   :  { %1098 = vmatmul.mubr.msk.f32.gmra.mxu1 %vm163_vm1, %v921_v24  ;;  %v953_v24 = vld [vmem:[%s1717_s3 + $0xd0] sm:$0xff] }
 0x1a1   :  { %1100 = vmatprep.mubr.msk.f32.mxu1 %vm1290_vm0, %v1289_v11 }
 0x1a4   :  { %1101 = vmatmul.mubr.msk.f32.gmra.mxu1 %vm163_vm1, %v922_v25 }
 0x1a5   :  { %1103 = vmatprep.mubr.msk.f32.mxu1 %vm1290_vm0, %v1289_v11 }
 0x1a8   :  { %1104 = vmatmul.mubr.msk.f32.gmra.mxu1 %vm163_vm1, %v923_v26 }
 0x1a9   :  { %1106 = vmatprep.mubr.msk.f32.mxu1 %vm1290_vm0, %v1289_v11 }
 0x1ac   :  { %1107 = vmatmul.mubr.msk.f32.gmra.mxu1 %vm163_vm1, %v924_v27 }
 0x1ad   :  { %1109 = vmatprep.mubr.msk.f32.mxu1 %vm1290_vm0, %v1289_v11 }
 0x1b0   :  { %1110 = vmatmul.mubr.msk.f32.gmra.mxu1 %vm163_vm1, %v925_v28 }
 0x1b1   :  { %1112 = vmatprep.mubr.msk.f32.mxu1 %vm1290_vm0, %v1289_v11 }
 0x1b4   :  { %1113 = vmatmul.mubr.msk.f32.gmra.mxu1 %vm163_vm1, %v926_v29 }
 0x1b5   :  { %1115 = vmatprep.mubr.msk.f32.mxu1 %vm1290_vm0, %v1289_v11 }
 0x1b8   :  { %1116 = vmatmul.mubr.msk.f32.gmra.mxu1 %vm163_vm1, %v927_v30 }
 0x1b9   :  { %1177 = vmatprep.mubr.msk.f32.mxu1 %vm1290_vm0, %v1289_v11 }
 0x258   :  { %v476_v34 = vpop.f32.mrf.mxu1 }
 0x25a   :  { %v1093_v36 = vpop.f32.mrf.mxu1 }
 0x25c   :  { %v481_v44 = vpop.f32.mrf.mxu1 }
 0x25d   :  { %v578_v9 = vadd.f32 %v1549_v40, %v481_v44 }
 0x25e   :  { %v1096_v45 = vpop.f32.mrf.mxu1 }
 0x260   :  { %v486_v47 = vpop.f32.mrf.mxu1 }
 0x261   :  { %v579_v8 = vadd.f32 %v550_v33, %v486_v47 }
 0x262   :  { %v1099_v48 = vpop.f32.mrf.mxu1 }
 0x264   :  { %v491_v49 = vpop.f32.mrf.mxu1 }
 0x265   :  { %v580_v7 = vadd.f32 %v1547_v39, %v491_v49 }
 0x266   :  { %v1102_v52 = vpop.f32.mrf.mxu1 }
 0x268   :  { %v496_v53 = vpop.f32.mrf.mxu1 }
 0x269   :  { %v581_v4 = vadd.f32 %v560_v32, %v496_v53 }
 0x26a   :  { %v1105_v54 = vpop.f32.mrf.mxu1 }
 0x26b   :  { %v744_v54 = vpop.permute.xlu0 %743 }
 0x26c   :  { %v501_v56 = vpop.f32.mrf.mxu1 }
 0x26d   :  { %v582_v1 = vadd.f32 %v1545_v38, %v501_v56 }
 0x26e   :  { %v1108_v57 = vpop.f32.mrf.mxu1 }
 0x270   :  { %v506_v58 = vpop.f32.mrf.mxu1 }
 0x271   :  { %v583_v62 = vadd.f32 %v570_v31, %v506_v58 }
 0x272   :  { %v1111_v60 = vpop.f32.mrf.mxu1 }
 0x274   :  { %v511_v61 = vpop.f32.mrf.mxu1 }
 0x275   :  { %v584_v63 = vadd.f32 %v1543_v37, %v511_v61  ;;  %v577_v37 = vadd.f32 %v540_v35, %v476_v34 }
 0x276   :  { %v1114_v0 = vpop.f32.mrf.mxu1 }
 0x277   :  { %1234 = vtanh.f32 %v584_v63  ;;  %v813_v0 = vld [vmem:[%s1719_s5] sm:$0xff] }
 0x278   :  { %v516_v3 = vpop.f32.mrf.mxu1  ;;  %1236 = vtanh.f32 %v583_v62 }
 0x279   :  { %v526_v5 = vadd.f32 %v524_v2, %v516_v3  ;;  %1238 = vtanh.f32 %v582_v1  ;;  %v891_v2 = vpop.permute.xlu1 %890 }
 0x27a   :  { %v1117_v6 = vpop.f32.mrf.mxu1  ;;  %1240 = vtanh.f32 %v581_v4 }
 0x27b   :  { %527 = vst [vmem:[#allocation2 + $0x1] sm:$0x1] %v526_v5  ;;  %1242 = vtanh.f32 %v580_v7 }
 0x27c   :  { %1244 = vtanh.f32 %v579_v8 }
 0x27d   :  { %1246 = vtanh.f32 %v578_v9 }
 0x27e   :  { %1248 = vtanh.f32 %v577_v37 }
 0x284   :  { %v1235_v38 = vpop.eup %1234 }
 0x285   :  { %1119 = vmatpush3.msra.mxu0 %v1235_v38  ;;  %v1237_v10 = vpop.eup %1236 }
 0x286   :  { %1120 = vmatprep.subr.mxu0 %v1289_v11  ;;  %v1239_v12 = vpop.eup %1238 }
 0x287   :  { %1121 = vmatpush3.msra.mxu0 %v1237_v10  ;;  %v1241_v39 = vpop.eup %1240 }
 0x288   :  { %1122 = vmatprep.subr.mxu0 %v1289_v11  ;;  %v1243_v40 = vpop.eup %1242 }
 0x289   :  { %1123 = vmatpush3.msra.mxu0 %v1239_v12  ;;  %v1245_v13 = vpop.eup %1244 }
 0x28a   :  { %1124 = vmatprep.subr.mxu0 %v1289_v11  ;;  %v1247_v14 = vpop.eup %1246 }
 0x28b   :  { %1125 = vmatpush3.msra.mxu0 %v1241_v39  ;;  %v1249_v16 = vpop.eup %1248 }
 0x28c   :  { %1126 = vmatprep.subr.mxu0 %v1289_v11 }
 0x28d   :  { %1127 = vmatpush3.msra.mxu0 %v1243_v40 }
 0x28e   :  { %1128 = vmatprep.subr.mxu0 %v1289_v11 }
 0x28f   :  { %1129 = vmatpush3.msra.mxu0 %v1245_v13 }
 0x290   :  { %1130 = vmatprep.subr.mxu0 %v1289_v11 }
 0x291   :  { %1131 = vmatpush3.msra.mxu0 %v1247_v14 }
 0x292   :  { %1132 = vmatprep.subr.mxu0 %v1289_v11 }
 0x293   :  { %1133 = vmatpush3.msra.mxu0 %v1249_v16 }
 0x294   :  { %1135 = vmatmul.mubr.msk.f32.vlgmr.msra.gmra.mxu0 %vm163_vm1, %v945_v15 }
 0x295   :  { %1137 = vmatprep.mubr.msk.f32.mxu0 %vm1290_vm0, %v1289_v11 }
 0x298   :  { %1138 = vmatmul.mubr.msk.f32.gmra.mxu0 %vm163_vm1, %v946_v17 }
 0x299   :  { %1140 = vmatprep.mubr.msk.f32.mxu0 %vm1290_vm0, %v1289_v11 }
 0x29c   :  { %1141 = vmatmul.mubr.msk.f32.gmra.mxu0 %vm163_vm1, %v947_v18 }
 0x29d   :  { %1143 = vmatprep.mubr.msk.f32.mxu0 %vm1290_vm0, %v1289_v11 }
 0x2a0   :  { %1144 = vmatmul.mubr.msk.f32.gmra.mxu0 %vm163_vm1, %v948_v19 }
 0x2a1   :  { %1146 = vmatprep.mubr.msk.f32.mxu0 %vm1290_vm0, %v1289_v11 }
 0x2a4   :  { %1147 = vmatmul.mubr.msk.f32.gmra.mxu0 %vm163_vm1, %v949_v20 }
 0x2a5   :  { %1149 = vmatprep.mubr.msk.f32.mxu0 %vm1290_vm0, %v1289_v11 }
 0x2a8   :  { %1150 = vmatmul.mubr.msk.f32.gmra.mxu0 %vm163_vm1, %v950_v21 }
 0x2a9   :  { %1152 = vmatprep.mubr.msk.f32.mxu0 %vm1290_vm0, %v1289_v11 }
 0x2ac   :  { %1153 = vmatmul.mubr.msk.f32.gmra.mxu0 %vm163_vm1, %v951_v22 }
 0x2ad   :  { %1155 = vmatprep.mubr.msk.f32.mxu0 %vm1290_vm0, %v1289_v11 }
 0x2b0   :  { %1156 = vmatmul.mubr.msk.f32.gmra.mxu0 %vm163_vm1, %v952_v23 }
 0x2b1   :  { %1158 = vmatprep.mubr.msk.f32.mxu0 %vm1290_vm0, %v1289_v11 }
 0x2b4   :  { %1159 = vmatmul.mubr.msk.f32.gmra.mxu0 %vm163_vm1, %v953_v24 }
 0x354   :  { %v696_v25 = vpop.f32.mrf.mxu0 }
 0x356   :  { %v1136_v26 = vpop.f32.mrf.mxu0 }
 0x358   :  { %v701_v27 = vpop.f32.mrf.mxu0 }
 0x35a   :  { %v1139_v28 = vpop.f32.mrf.mxu0 }
 0x35c   :  { %v706_v29 = vpop.f32.mrf.mxu0 }
 0x35d   :  { %v799_v62 = vadd.f32 %v1625_v55, %v706_v29 }
 0x35e   :  { %v1142_v30 = vpop.f32.mrf.mxu0 }
 0x360   :  { %v711_v31 = vpop.f32.mrf.mxu0 }
 0x361   :  { %v800_v61 = vadd.f32 %v1555_v43, %v711_v31 }
 0x362   :  { %v1145_v32 = vpop.f32.mrf.mxu0 }
 0x364   :  { %v716_v33 = vpop.f32.mrf.mxu0 }
 0x365   :  { %v801_v57 = vadd.f32 %v1623_v50, %v716_v33 }
 0x366   :  { %v1148_v34 = vpop.f32.mrf.mxu0 }
 0x368   :  { %v721_v35 = vpop.f32.mrf.mxu0 }
 0x369   :  { %v802_v53 = vadd.f32 %v1553_v42, %v721_v35  ;;  %v797_v42 = vadd.f32 %v1627_v59, %v696_v25 }
 0x36a   :  { %v1151_v36 = vpop.f32.mrf.mxu0 }
 0x36c   :  { %v726_v44 = vpop.f32.mrf.mxu0 }
 0x36d   :  { %v803_v48 = vadd.f32 %v1621_v46, %v726_v44 }
 0x36e   :  { %v1154_v45 = vpop.f32.mrf.mxu0 }
 0x370   :  { %v731_v47 = vpop.f32.mrf.mxu0 }
 0x371   :  { %v804_v49 = vadd.f32 %v1551_v41, %v731_v47  ;;  %v798_v41 = vadd.f32 %v1557_v51, %v701_v27 }
 0x372   :  { %v1157_v52 = vpop.f32.mrf.mxu0 }
 0x373   :  { %1250 = vtanh.f32 %v804_v49 }
 0x374   :  { %v736_v56 = vpop.f32.mrf.mxu0  ;;  %1252 = vtanh.f32 %v803_v48 }
 0x375   :  { %v746_v58 = vadd.f32 %v744_v54, %v736_v56  ;;  %1254 = vtanh.f32 %v802_v53 }
 0x376   :  { %v1160_v60 = vpop.f32.mrf.mxu0  ;;  %1256 = vtanh.f32 %v801_v57 }
 0x377   :  { %747 = vst [vmem:[#allocation2 + $0x2] sm:$0x1] %v746_v58  ;;  %1258 = vtanh.f32 %v800_v61 }
 0x378   :  { %1260 = vtanh.f32 %v799_v62 }
 0x379   :  { %1262 = vtanh.f32 %v798_v41 }
 0x37a   :  { %1264 = vtanh.f32 %v797_v42 }
 0x380   :  { %v1251_v46 = vpop.eup %1250 }
 0x381   :  { %1162 = vmatpush3.msra.mxu1 %v1251_v46  ;;  %v1253_v50 = vpop.eup %1252 }
 0x382   :  { %1163 = vmatprep.subr.mxu1 %v1289_v11  ;;  %v1255_v43 = vpop.eup %1254 }
 0x383   :  { %1164 = vmatpush3.msra.mxu1 %v1253_v50  ;;  %v1257_v55 = vpop.eup %1256 }
 0x384   :  { %1165 = vmatprep.subr.mxu1 %v1289_v11  ;;  %v1259_v51 = vpop.eup %1258 }
 0x385   :  { %1166 = vmatpush3.msra.mxu1 %v1255_v43  ;;  %v1261_v59 = vpop.eup %1260 }
 0x386   :  { %1167 = vmatprep.subr.mxu1 %v1289_v11  ;;  %v1263_v63 = vpop.eup %1262 }
 0x387   :  { %1168 = vmatpush3.msra.mxu1 %v1257_v55  ;;  %v1265_v1 = vpop.eup %1264 }
 0x388   :  { %1169 = vmatprep.subr.mxu1 %v1289_v11 }
 0x389   :  { %1170 = vmatpush3.msra.mxu1 %v1259_v51 }
 0x38a   :  { %1171 = vmatprep.subr.mxu1 %v1289_v11 }
 0x38b   :  { %1172 = vmatpush3.msra.mxu1 %v1261_v59 }
 0x38c   :  { %1173 = vmatprep.subr.mxu1 %v1289_v11 }
 0x38d   :  { %1174 = vmatpush3.msra.mxu1 %v1263_v63 }
 0x38e   :  { %1175 = vmatprep.subr.mxu1 %v1289_v11 }
 0x38f   :  { %1176 = vmatpush3.msra.mxu1 %v1265_v1 }
 0x390   :  { %1178 = vmatmul.mubr.msk.f32.vlgmr.msra.gmra.mxu1 %vm163_vm1, %v813_v0 }
 0x450   :  { %v883_v3 = vpop.f32.mrf.mxu1 }
 0x451   :  { %v893_v4 = vadd.f32 %v891_v2, %v883_v3 }
 0x452   :  { %v1179_v5 = vpop.f32.mrf.mxu1 }
 0x453   :  { %894 = vst [vmem:[#allocation2 + $0x3] sm:$0x3] %v893_v4 }
 0x454   :  { %1277 = shalt.err (!%p1274_p4)
}
 0x455   :  { %904 = dma.vmem_to_hbm [thread:$0]  %s902_s0, 128, %s1721_s7, [#allocation3]  }
 0x456   :  { %1286 = dma.done.wait [#allocation3], 128  }
 0x457   :  { %1287 = vsyncadd [#allocation3], 4294967168 }
 0x458   :  { %908 = vsyncpa [#allocation3], 1 }

</bundles_post_ra>
